<compile_context>
chip_gen: v6e
topology: v6e:2x2x1
jax: 0.10.0
libtpu: 0.0.40
codegen_flags: <defaults>
</compile_context>

<pallas_src>
import functools

import jax
import jax.numpy as jnp
from jax.experimental import pallas as pl
from jax.experimental.pallas import tpu as pltpu

LOG_STD_MIN = -20.0
LOG_STD_MAX = 2.0


def _actor_kernel(act_dim,
                  x_ref, w1_ref, b1_ref, w2_ref, b2_ref, wh_ref, bh_ref,
                  out_ref):
    # Layer 1: bf16 x bf16 -> f32 MXU accumulate, then bf16 bias + ReLU epilogue
    # (fewer VALU passes over the (tb, 256) slab; output is already the bf16
    # operand of the next matmul, so no extra cast).
    h1 = jnp.dot(x_ref[...], w1_ref[...], preferred_element_type=jnp.float32)
    h1 = jnp.maximum(h1.astype(jnp.bfloat16) + b1_ref[...], 0.0)

    # Layer 2.
    h2 = jnp.dot(h1, w2_ref[...], preferred_element_type=jnp.float32)
    h2 = jnp.maximum(h2.astype(jnp.bfloat16) + b2_ref[...], 0.0)

    # Fused heads: [mean | log_std] = h2 @ [Wm | Ws] + [bm | bs].
    # Head epilogue stays in f32 (slab is only 2*act_dim lanes wide).
    head = jnp.dot(h2, wh_ref[...], preferred_element_type=jnp.float32)
    head = head + bh_ref[...]

    # Clamp only the log_std columns.  The (1, n_out) iota broadcasts inside the
    # where, avoiding two full-slab VPU passes of a (tb, n_out) iota + compare.
    col = jax.lax.broadcasted_iota(jnp.int32, (1, head.shape[1]), 1)
    head = jnp.where(col >= act_dim,
                     jnp.clip(head, LOG_STD_MIN, LOG_STD_MAX),
                     head)

    # TODO(synk): optionally repack 8 batch rows per 128-lane row before the
    # store to avoid 16-lane masked vst; skipped pending verification that the
    # in-kernel reshape lowers without an XLU/VMEM bounce.
    out_ref[...] = head.astype(out_ref.dtype)


def pack_actor_params(params):
    """One-time parameter packing (hoisted out of the per-call wrapper).

    Fuses the mean/log_std heads and pre-casts MXU operands + hidden biases to
    bf16.  `params` holds (in_features, out_features)-layout weights."""
    return {
        "w1": params["w1"].astype(jnp.bfloat16),
        "b1": params["b1"].reshape(1, -1).astype(jnp.bfloat16),
        "w2": params["w2"].astype(jnp.bfloat16),
        "b2": params["b2"].reshape(1, -1).astype(jnp.bfloat16),
        "wh": jnp.concatenate([params["wm"], params["ws"]], axis=1
                              ).astype(jnp.bfloat16),
        "bh": jnp.concatenate([params["bm"], params["bs"]], axis=1
                              ).reshape(1, -1).astype(jnp.float32),
    }


def _choose_batch_tile(B, block_b):
    """Balanced batch tiles: each <= block_b rows, a multiple of 8 sublanes,
    with an even tile count for large B so v7x megacore gets >= 2 grid steps
    and padding waste stays below one tile."""
    n_tiles = max(1, pl.cdiv(B, block_b))
    if B >= 1024 and n_tiles % 2 == 1:
        n_tiles += 1
    tb = ((pl.cdiv(B, n_tiles) + 7) // 8) * 8
    padded_b = pl.cdiv(B, tb) * tb
    return tb, padded_b


def actor_forward(state, packed, *, block_b=4096):
    """state: (B, obs_dim) float32.  packed: output of pack_actor_params()."""
    B, obs_dim = state.shape
    hidden = packed["w1"].shape[1]
    n_out = packed["wh"].shape[1]
    act_dim = n_out // 2

    x = state.astype(jnp.bfloat16)

    tb, padded_b = _choose_batch_tile(B, block_b)
    if padded_b != B:
        x = jnp.pad(x, ((0, padded_b - B), (0, 0)))

    grid = (padded_b // tb,)
    const2 = lambda i: (0, 0)

    flops = 2 * padded_b * (obs_dim * hidden + hidden * hidden + hidden * n_out)
    bytes_accessed = (padded_b * obs_dim * 2                                   # state (bf16)
                      + (packed["w1"].size + packed["w2"].size
                         + packed["wh"].size) * 2                             # weights (bf16)
                      + (packed["b1"].size + packed["b2"].size) * 2           # hidden biases (bf16)
                      + packed["bh"].size * 4                                 # head bias (f32)
                      + padded_b * n_out * 4)                                 # output (f32)

    out = pl.pallas_call(
        functools.partial(_actor_kernel, act_dim),
        out_shape=jax.ShapeDtypeStruct((padded_b, n_out), jnp.float32),
        grid=grid,
        in_specs=[
            pl.BlockSpec((tb, obs_dim), lambda i: (i, 0)),   # state tile
            pl.BlockSpec((obs_dim, hidden), const2),         # W1 (resident)
            pl.BlockSpec((1, hidden), const2),               # b1
            pl.BlockSpec((hidden, hidden), const2),          # W2
            pl.BlockSpec((1, hidden), const2),               # b2
            pl.BlockSpec((hidden, n_out), const2),           # [Wm|Ws]
            pl.BlockSpec((1, n_out), const2),                # [bm|bs]
        ],
        out_specs=pl.BlockSpec((tb, n_out), lambda i: (i, 0)),
        compiler_params=pltpu.CompilerParams(
            dimension_semantics=("parallel",),
            vmem_limit_bytes=48 * 1024 * 1024),
        cost_estimate=pl.CostEstimate(
            flops=flops, transcendentals=0, bytes_accessed=bytes_accessed),
    )(x, packed["w1"], packed["b1"], packed["w2"], packed["b2"],
      packed["wh"], packed["bh"])

    out = out[:B]
    mean = out[:, :act_dim]
    log_std = out[:, act_dim:]
    return mean, log_std


def init_actor_params(key, obs_dim, act_dim, hidden=256, init_w=0.003):
    """Deterministic synthetic init mirroring the PyTorch module's shapes.

    Weights are stored as (in_features, out_features)."""
    ks = jax.random.split(key, 8)

    def linear_init(kw, kb, fan_in, fan_out):
        # PyTorch default nn.Linear init: U(-1/sqrt(fan_in), 1/sqrt(fan_in))
        bound = 1.0 / jnp.sqrt(jnp.float32(fan_in))
        w = jax.random.uniform(kw, (fan_in, fan_out), jnp.float32, -bound, bound)
        b = jax.random.uniform(kb, (1, fan_out), jnp.float32, -bound, bound)
        return w, b

    w1, b1 = linear_init(ks[0], ks[1], obs_dim, hidden)
    w2, b2 = linear_init(ks[2], ks[3], hidden, hidden)
    # heads: U(-init_w, init_w) as in the PyTorch module
    wm = jax.random.uniform(ks[4], (hidden, act_dim), jnp.float32, -init_w, init_w)
    bm = jax.random.uniform(ks[5], (1, act_dim), jnp.float32, -init_w, init_w)
    ws = jax.random.uniform(ks[6], (hidden, act_dim), jnp.float32, -init_w, init_w)
    bs = jax.random.uniform(ks[7], (1, act_dim), jnp.float32, -init_w, init_w)
    return {"w1": w1, "b1": b1, "w2": w2, "b2": b2,
            "wm": wm, "bm": bm, "ws": ws, "bs": bs}


def actor_forward_ref_f32(state, p):
    """Pure f32 reference (matches the PyTorch module exactly)."""
    h1 = jnp.maximum(state @ p["w1"] + p["b1"], 0.0)
    h2 = jnp.maximum(h1 @ p["w2"] + p["b2"], 0.0)
    mean = h2 @ p["wm"] + p["bm"]
    log_std = jnp.clip(h2 @ p["ws"] + p["bs"], LOG_STD_MIN, LOG_STD_MAX)
    return mean, log_std


def actor_forward_ref_bf16(state, packed):
    """Reference mimicking the kernel's bf16-operand / f32-accumulate math
    with the bf16 bias+ReLU epilogue on the hidden layers."""
    f32 = jnp.float32
    bf = jnp.bfloat16
    n_out = packed["wh"].shape[1]
    act_dim = n_out // 2

    x = state.astype(bf)
    h1 = jnp.maximum(
        jnp.dot(x, packed["w1"], preferred_element_type=f32).astype(bf)
        + packed["b1"], 0.0)
    h2 = jnp.maximum(
        jnp.dot(h1, packed["w2"], preferred_element_type=f32).astype(bf)
        + packed["b2"], 0.0)
    head = jnp.dot(h2, packed["wh"], preferred_element_type=f32) + packed["bh"]
    mean = head[:, :act_dim]
    log_std = jnp.clip(head[:, act_dim:], LOG_STD_MIN, LOG_STD_MAX)
    return mean, log_std


if __name__ == "__main__":
    key = jax.random.PRNGKey(0)
    k_params, k_state = jax.random.split(key)

    batch = 8
    obs_dim = 16
    act_dim = 8

    params = init_actor_params(k_params, obs_dim, act_dim)
    packed = pack_actor_params(params)          # one-time packing, hoisted
    state = jax.random.normal(k_state, (batch, obs_dim), jnp.float32)

    mean, log_std = actor_forward(state, packed)
    jax.block_until_ready((mean, log_std))

    # tight check against a reference using the same bf16 math as the kernel
    mean_bf, log_std_bf = actor_forward_ref_bf16(state, packed)
    assert jnp.allclose(mean, mean_bf, atol=1e-2, rtol=1e-2), \
        "mean mismatch (bf16 ref)"
    assert jnp.allclose(log_std, log_std_bf, atol=1e-2, rtol=1e-2), \
        "log_std mismatch (bf16 ref)"

    # loose check against the exact f32 PyTorch-equivalent reference
    mean_f32, log_std_f32 = actor_forward_ref_f32(state, params)
    assert jnp.allclose(mean, mean_f32, atol=5e-2, rtol=5e-2), \
        "mean mismatch (f32 ref)"
    assert jnp.allclose(log_std, log_std_f32, atol=5e-2, rtol=5e-2), \
        "log_std mismatch (f32 ref)"

    print("KERNEL_OK")
</pallas_src>

<mosaic_0001>
module attributes {stable_mosaic.version = 11 : i64} {
  func.func @_actor_kernel(%arg0: i32, %arg1: memref<8x16xbf16, #tpu.memory_space<vmem>>, %arg2: memref<16x256xbf16, #tpu.memory_space<vmem>>, %arg3: memref<1x256xbf16, #tpu.memory_space<vmem>>, %arg4: memref<256x256xbf16, #tpu.memory_space<vmem>>, %arg5: memref<1x256xbf16, #tpu.memory_space<vmem>>, %arg6: memref<256x16xbf16, #tpu.memory_space<vmem>>, %arg7: memref<1x16xf32, #tpu.memory_space<vmem>>, %arg8: memref<8x16xf32, #tpu.memory_space<vmem>>) attributes {dimension_semantics = [#tpu.dimension_semantics<parallel>], iteration_bounds = array<i64: 1>, scalar_prefetch = 0 : i64, scratch_operands = 0 : i64, tpu.core_type = #tpu.core_type<tc>, window_params = [{transform_indices = @transform_0, window_bounds = array<i64: 8, 16>}, {pipeline_mode = #tpu.pipeline_mode<synchronous>, transform_indices = @transform_1, window_bounds = array<i64: 16, 256>}, {pipeline_mode = #tpu.pipeline_mode<synchronous>, transform_indices = @transform_2, window_bounds = array<i64: 1, 256>}, {pipeline_mode = #tpu.pipeline_mode<synchronous>, transform_indices = @transform_3, window_bounds = array<i64: 256, 256>}, {pipeline_mode = #tpu.pipeline_mode<synchronous>, transform_indices = @transform_4, window_bounds = array<i64: 1, 256>}, {pipeline_mode = #tpu.pipeline_mode<synchronous>, transform_indices = @transform_5, window_bounds = array<i64: 256, 16>}, {pipeline_mode = #tpu.pipeline_mode<synchronous>, transform_indices = @transform_6, window_bounds = array<i64: 1, 16>}, {transform_indices = @transform_7, window_bounds = array<i64: 8, 16>}]} {
    %c0 = arith.constant 0 : index
    %c0_0 = arith.constant 0 : index
    %0 = vector.load %arg1[%c0, %c0_0] : memref<8x16xbf16, #tpu.memory_space<vmem>>, vector<8x16xbf16>
    %c0_1 = arith.constant 0 : index
    %c0_2 = arith.constant 0 : index
    %1 = vector.load %arg2[%c0_1, %c0_2] : memref<16x256xbf16, #tpu.memory_space<vmem>>, vector<16x256xbf16>
    %cst = arith.constant dense<0.000000e+00> : vector<8x256xf32>
    %2 = tpu.matmul %0, %1, %cst {dimension_numbers = #tpu.dot_dimension_numbers<[1], [0], [0], [1], [0, 0, 1, 1], [], []>} : vector<8x16xbf16>, vector<16x256xbf16>, vector<8x256xf32> -> vector<8x256xf32>
    %3 = arith.truncf %2 : vector<8x256xf32> to vector<8x256xbf16>
    %c0_3 = arith.constant 0 : index
    %c0_4 = arith.constant 0 : index
    %4 = vector.load %arg3[%c0_3, %c0_4] : memref<1x256xbf16, #tpu.memory_space<vmem>>, vector<1x256xbf16>
    %5 = vector.broadcast %4 : vector<1x256xbf16> to vector<8x256xbf16>
    %6 = arith.addf %3, %5 : vector<8x256xbf16>
    %cst_5 = arith.constant 0.000000e+00 : bf16
    %7 = vector.broadcast %cst_5 : bf16 to vector<8x256xbf16>
    %8 = arith.maximumf %6, %7 : vector<8x256xbf16>
    %c0_6 = arith.constant 0 : index
    %c0_7 = arith.constant 0 : index
    %9 = vector.load %arg4[%c0_6, %c0_7] : memref<256x256xbf16, #tpu.memory_space<vmem>>, vector<256x256xbf16>
    %cst_8 = arith.constant dense<0.000000e+00> : vector<8x256xf32>
    %10 = tpu.matmul %8, %9, %cst_8 {dimension_numbers = #tpu.dot_dimension_numbers<[1], [0], [0], [1], [0, 0, 1, 1], [], []>} : vector<8x256xbf16>, vector<256x256xbf16>, vector<8x256xf32> -> vector<8x256xf32>
    %11 = arith.truncf %10 : vector<8x256xf32> to vector<8x256xbf16>
    %c0_9 = arith.constant 0 : index
    %c0_10 = arith.constant 0 : index
    %12 = vector.load %arg5[%c0_9, %c0_10] : memref<1x256xbf16, #tpu.memory_space<vmem>>, vector<1x256xbf16>
    %13 = vector.broadcast %12 : vector<1x256xbf16> to vector<8x256xbf16>
    %14 = arith.addf %11, %13 : vector<8x256xbf16>
    %cst_11 = arith.constant 0.000000e+00 : bf16
    %15 = vector.broadcast %cst_11 : bf16 to vector<8x256xbf16>
    %16 = arith.maximumf %14, %15 : vector<8x256xbf16>
    %c0_12 = arith.constant 0 : index
    %c0_13 = arith.constant 0 : index
    %17 = vector.load %arg6[%c0_12, %c0_13] : memref<256x16xbf16, #tpu.memory_space<vmem>>, vector<256x16xbf16>
    %cst_14 = arith.constant dense<0.000000e+00> : vector<8x16xf32>
    %18 = tpu.matmul %16, %17, %cst_14 {dimension_numbers = #tpu.dot_dimension_numbers<[1], [0], [0], [1], [0, 0, 1, 1], [], []>} : vector<8x256xbf16>, vector<256x16xbf16>, vector<8x16xf32> -> vector<8x16xf32>
    %c0_15 = arith.constant 0 : index
    %c0_16 = arith.constant 0 : index
    %19 = vector.load %arg7[%c0_15, %c0_16] : memref<1x16xf32, #tpu.memory_space<vmem>>, vector<1x16xf32>
    %20 = vector.broadcast %19 : vector<1x16xf32> to vector<8x16xf32>
    %21 = arith.addf %18, %20 : vector<8x16xf32>
    %22 = tpu.iota {dimensions = array<i32: 1>} : vector<1x16xi32>
    %c8_i32 = arith.constant 8 : i32
    %23 = vector.broadcast %c8_i32 : i32 to vector<1x16xi32>
    %24 = arith.cmpi sge, %22, %23 : vector<1x16xi32>
    %cst_17 = arith.constant -2.000000e+01 : f32
    %cst_18 = arith.constant 2.000000e+00 : f32
    %25 = vector.broadcast %cst_17 : f32 to vector<8x16xf32>
    %26 = arith.maximumf %25, %21 : vector<8x16xf32>
    %27 = vector.broadcast %cst_18 : f32 to vector<8x16xf32>
    %28 = arith.minimumf %27, %26 : vector<8x16xf32>
    %29 = vector.shape_cast %24 : vector<1x16xi1> to vector<1x16xi1>
    %30 = vector.broadcast %29 : vector<1x16xi1> to vector<8x16xi1>
    %31 = arith.select %30, %28, %21 : vector<8x16xi1>, vector<8x16xf32>
    %c0_19 = arith.constant 0 : index
    %c0_20 = arith.constant 0 : index
    %32 = vector.load %arg8[%c0_19, %c0_20] : memref<8x16xf32, #tpu.memory_space<vmem>>, vector<8x16xf32>
    tpu.vector_store %arg8[%c0_19, %c0_20], %31 {strides = array<i32>} : memref<8x16xf32, #tpu.memory_space<vmem>>, vector<8x16xf32>,
    return
  }
  func.func @transform_0(%arg0: i32) -> (i32, i32) {
    %c0_i32 = arith.constant 0 : i32
    %c0_i32_0 = arith.constant 0 : i32
    return %arg0, %c0_i32 : i32, i32
  }
  func.func @transform_1(%arg0: i32) -> (i32, i32) {
    %c0_i32 = arith.constant 0 : i32
    %c0_i32_0 = arith.constant 0 : i32
    %c0_i32_1 = arith.constant 0 : i32
    return %c0_i32, %c0_i32_0 : i32, i32
  }
  func.func @transform_2(%arg0: i32) -> (i32, i32) {
    %c0_i32 = arith.constant 0 : i32
    %c0_i32_0 = arith.constant 0 : i32
    %c0_i32_1 = arith.constant 0 : i32
    return %c0_i32, %c0_i32_0 : i32, i32
  }
  func.func @transform_3(%arg0: i32) -> (i32, i32) {
    %c0_i32 = arith.constant 0 : i32
    %c0_i32_0 = arith.constant 0 : i32
    %c0_i32_1 = arith.constant 0 : i32
    return %c0_i32, %c0_i32_0 : i32, i32
  }
  func.func @transform_4(%arg0: i32) -> (i32, i32) {
    %c0_i32 = arith.constant 0 : i32
    %c0_i32_0 = arith.constant 0 : i32
    %c0_i32_1 = arith.constant 0 : i32
    return %c0_i32, %c0_i32_0 : i32, i32
  }
  func.func @transform_5(%arg0: i32) -> (i32, i32) {
    %c0_i32 = arith.constant 0 : i32
    %c0_i32_0 = arith.constant 0 : i32
    %c0_i32_1 = arith.constant 0 : i32
    return %c0_i32, %c0_i32_0 : i32, i32
  }
  func.func @transform_6(%arg0: i32) -> (i32, i32) {
    %c0_i32 = arith.constant 0 : i32
    %c0_i32_0 = arith.constant 0 : i32
    %c0_i32_1 = arith.constant 0 : i32
    return %c0_i32, %c0_i32_0 : i32, i32
  }
  func.func @transform_7(%arg0: i32) -> (i32, i32) {
    %c0_i32 = arith.constant 0 : i32
    %c0_i32_0 = arith.constant 0 : i32
    return %arg0, %c0_i32 : i32, i32
  }
}

</mosaic_0001>

<bundles_post_ra>
// kernel: tpu_custom_call.1
= control target key start
LH: loop header
LB: loop body
LE: loop exit
PB: predicated region body
PF: predicated region fallthrough
CT: control target
= control target key end

     0   :  { %12 = vsyncpa [#allocation3], 0  ;;  %s938_s0 = inlined_call_operand.vmem [shape: bf16[8,16], index: 0, kind: input, shape index: {}]   ;;  %s939_s1 = inlined_call_operand.vmem [shape: bf16[16,256], index: 1, kind: input, shape index: {}]   ;;  %s940_s2 = inlined_call_operand.vmem [shape: bf16[1,256], index: 2, kind: input, shape index: {}]   ;;  %s941_s3 = inlined_call_operand.hbm [shape: bf16[256,256], index: 3, kind: input, shape index: {}]   ;;  %s942_s4 = inlined_call_operand.vmem [shape: bf16[1,256], index: 4, kind: input, shape index: {}]   ;;  %s943_s5 = inlined_call_operand.vmem [shape: bf16[256,16], index: 5, kind: input, shape index: {}]   ;;  %s944_s6 = inlined_call_operand.vmem [shape: f32[1,16], index: 6, kind: input, shape index: {}]   ;;  %s945_s7 = inlined_call_operand.hbm [shape: f32[8,16], index: 7, kind: output, shape index: {}]  }
   0x1   :  { %13 = vsyncpa [#allocation4], 0  ;;  %s813_s24 = smov [#allocation2]  }
   0x2   :  { %s25_s25 = sshll.u32 %s813_s24, 4  ;;  %s26_s25 = int_to_ptr.vmem [resolvable:$true] %s25_s25 }
   0x3   :  { %s777_s26 = scalar_lea.vmem %s26_s25, 4096  ;;  %p782_p1 = scmp.lt.s32.totalorder %s26_s25, %s26_s25 }
   0x4   :  { %p778_p0 = scmp.ne.s32.totalorder %s26_s25, %s777_s26  ;;  %p783_p2 = scmp.lt.s32.totalorder %s777_s26, %s777_s26 }
   0x6   :  { %p784_p3 = por %p783_p2, %p782_p1 }
   0x8   :  { %p785_p4 = pnand %p784_p3, %p778_p0 }
   0xa   :  { %788 = shalt.err (!%p785_p4)
}
   0xb   :  { %s814_s27 = smov 128   ;;  %s815_s28 = smov 8  }
   0xc   :  { %31 = dma.hbm_to_vmem [thread:$0]  %s941_s3, 4096, %s26_s25, [#allocation3], %s814_s27, %s814_s27, %s815_s28  }
   0xd   :  { %809 = dma.done.wait [#allocation3], 4096  }
   0xe   :  { %810 = vsyncadd [#allocation3], 4294963200  ;;  %v816_v0 = vmov 0   ;;  %v702_v1 = vld [vmem:[%s939_s1 + $0x4] ss:$8 sps:$4 sm:$0xff]   ;;  %vm55_vm0 = vcmask 130048   ;;  %v115_v50 = vlaneseq }
   0xf   :  { %91 = vmatprep.mubr.bf16.mxu0 %v816_v0  ;;  %v704_v2 = vld [vmem:[%s939_s1] ss:$8 sps:$4 sm:$0xff]   ;;  %73 = vmatprep.subr.bf16.mxu0 %v702_v1  ;;  %v705_v4 = vld [vmem:[#allocation2 + $0x74] ss:$8 sps:$4 sm:$0xff]   ;;  %v707_v5 = vld [vmem:[#allocation2 + $0x70] ss:$8 sps:$4 sm:$0xff]  }
  0x10   :  { %v42_v3 = vld [vmem:[%s938_s0] sm:$0xf]  ;;  %74 = vmatpush1.bf16.msra.mxu0 %v704_v2  ;;  %v708_v6 = vld [vmem:[#allocation2 + $0x64] ss:$8 sps:$4 sm:$0xff]   ;;  %336 = vmatprep.subr.bf16.mxu1 %v705_v4  ;;  %v711_v8 = vld [vmem:[#allocation2 + $0x54] ss:$8 sps:$4 sm:$0xff]  }
  0x11   :  { %337 = vmatpush1.bf16.msra.mxu1 %v707_v5  ;;  %v710_v7 = vld [vmem:[#allocation2 + $0x60] ss:$8 sps:$4 sm:$0xff]   ;;  %v713_v9 = vld [vmem:[#allocation2 + $0x50] ss:$8 sps:$4 sm:$0xff]   ;;  %v714_v10 = vld [vmem:[#allocation2 + $0x44] ss:$8 sps:$4 sm:$0xff]  }
  0x12   :  { %338 = vmatprep.subr.bf16.mxu1 %v708_v6  ;;  %v716_v11 = vld [vmem:[#allocation2 + $0x40] ss:$8 sps:$4 sm:$0xff]   ;;  %v717_v12 = vld [vmem:[#allocation2 + $0x34] ss:$8 sps:$4 sm:$0xff]   ;;  %v719_v13 = vld [vmem:[#allocation2 + $0x30] ss:$8 sps:$4 sm:$0xff]  }
  0x13   :  { %622 = vmatmul.mubr.msk.bf16.vlgmr.msra.gmra.mxu0 %vm55_vm0, %v42_v3  ;;  %v720_v14 = vld [vmem:[#allocation2 + $0x24] ss:$8 sps:$4 sm:$0xff]   ;;  %v722_v15 = vld [vmem:[#allocation2 + $0x20] ss:$8 sps:$4 sm:$0xff]   ;;  %v723_v16 = vld [vmem:[#allocation2 + $0x14] ss:$8 sps:$4 sm:$0xff]  }
  0x14   :  { %v725_v17 = vld [vmem:[#allocation2 + $0x10] ss:$8 sps:$4 sm:$0xff]   ;;  %v726_v18 = vld [vmem:[#allocation2 + $0x4] ss:$8 sps:$4 sm:$0xff]   ;;  %v728_v19 = vld [vmem:[#allocation2] ss:$8 sps:$4 sm:$0xff]  }
  0x15   :  { %339 = vmatpush1.bf16.msra.mxu1 %v710_v7  ;;  %v729_v20 = vld [vmem:[#allocation2 + $0xf4] ss:$8 sps:$4 sm:$0xff]   ;;  %v731_v21 = vld [vmem:[#allocation2 + $0xf0] ss:$8 sps:$4 sm:$0xff]   ;;  %v732_v22 = vld [vmem:[#allocation2 + $0xe4] ss:$8 sps:$4 sm:$0xff]  }
  0x16   :  { %340 = vmatprep.subr.bf16.mxu1 %v711_v8  ;;  %v734_v23 = vld [vmem:[#allocation2 + $0xe0] ss:$8 sps:$4 sm:$0xff]   ;;  %v735_v24 = vld [vmem:[#allocation2 + $0xd4] ss:$8 sps:$4 sm:$0xff]   ;;  %v737_v25 = vld [vmem:[#allocation2 + $0xd0] ss:$8 sps:$4 sm:$0xff]  }
  0x17   :  { %v738_v26 = vld [vmem:[#allocation2 + $0xc4] ss:$8 sps:$4 sm:$0xff]   ;;  %v740_v27 = vld [vmem:[#allocation2 + $0xc0] ss:$8 sps:$4 sm:$0xff]   ;;  %v741_v28 = vld [vmem:[#allocation2 + $0xb4] ss:$8 sps:$4 sm:$0xff]  }
  0x18   :  { %v743_v29 = vld [vmem:[#allocation2 + $0xb0] ss:$8 sps:$4 sm:$0xff]   ;;  %v744_v30 = vld [vmem:[#allocation2 + $0xa4] ss:$8 sps:$4 sm:$0xff]   ;;  %v746_v31 = vld [vmem:[#allocation2 + $0xa0] ss:$8 sps:$4 sm:$0xff]  }
  0x19   :  { %341 = vmatpush1.bf16.msra.mxu1 %v713_v9  ;;  %v747_v32 = vld [vmem:[#allocation2 + $0x94] ss:$8 sps:$4 sm:$0xff]   ;;  %v749_v33 = vld [vmem:[#allocation2 + $0x90] ss:$8 sps:$4 sm:$0xff]   ;;  %v750_v34 = vld [vmem:[#allocation2 + $0x84] ss:$8 sps:$4 sm:$0xff]  }
  0x1a   :  { %342 = vmatprep.subr.bf16.mxu1 %v714_v10  ;;  %v752_v35 = vld [vmem:[#allocation2 + $0x80] ss:$8 sps:$4 sm:$0xff]   ;;  %v753_v36 = vld [vmem:[%s943_s5 + $0x78] sm:$0xff]   ;;  %v755_v38 = vld [vmem:[%s943_s5 + $0x70] sm:$0xff]   ;;  %v817_v48 = vmov 1966171168  }
  0x1b   :  { %v754_v37 = vld [vmem:[%s943_s5 + $0x38] sm:$0xff]   ;;  %674 = vmatprep.subr.bf16.mxu0 %v753_v36  ;;  %v756_v39 = vld [vmem:[%s943_s5 + $0x30] sm:$0xff]   ;;  %v757_v40 = vld [vmem:[%s943_s5 + $0x68] sm:$0xff]   ;;  %v113_v49 = vunpack.c.l.s4 %v817_v48  ;;  %v116_v52 = vshrl.u32 %v115_v50, 7  ;;  %s818_s20 = smov [#allocation5]  }
  0x1c   :  { %675 = vmatpush3.bf16.msra.mxu0 %v754_v37  ;;  %v758_v41 = vld [vmem:[%s943_s5 + $0x28] sm:$0xff]   ;;  %v759_v42 = vld [vmem:[%s943_s5 + $0x60] sm:$0xff]   ;;  %v761_v44 = vld [vmem:[%s943_s5 + $0x58] sm:$0xff]   ;;  %v597_v37 = vand.u32 127, %v115_v50  ;;  %s611_s21 = sshll.u32 %s818_s20, 4  ;;  %s612_s21 = int_to_ptr.vmem [resolvable:$true] %s611_s21 }
  0x1d   :  { %343 = vmatpush1.bf16.msra.mxu1 %v716_v11  ;;  %676 = vmatprep.subr.bf16.mxu0 %v755_v38  ;;  %v760_v43 = vld [vmem:[%s943_s5 + $0x20] sm:$0xff]   ;;  %v762_v45 = vld [vmem:[%s943_s5 + $0x18] sm:$0xff]   ;;  %v763_v46 = vld [vmem:[%s943_s5 + $0x50] sm:$0xff]   ;;  %v114_v51 = vunpack.c.0.s8 %v113_v49  ;;  %v131_v59 = vsub.s32 0, %v116_v52  ;;  %s789_s22 = scalar_lea.vmem %s612_s21, 128  ;;  %p794_p6 = scmp.lt.s32.totalorder %s612_s21, %s612_s21 }
  0x1e   :  { %344 = vmatprep.subr.bf16.mxu1 %v717_v12  ;;  %v764_v47 = vld [vmem:[%s943_s5 + $0x10] sm:$0xff]   ;;  %v623_v53 = vld.sshfl [vmem:[%s940_s2] sm:$0x11 pattern:$0x75316420]  ;;  %v765_v10 = vld [vmem:[%s943_s5 + $0x48] sm:$0xff]   ;;  %p790_p5 = scmp.ne.s32.totalorder %s612_s21, %s789_s22  ;;  %p795_p7 = scmp.lt.s32.totalorder %s789_s22, %s789_s22 }
  0x1f   :  { %v117_v54 = vsub.s32 %v114_v51, %v116_v52  ;;  %v111_v55 = vcombine.high %v623_v53, %v623_v53  ;;  %v766_v11 = vld [vmem:[%s943_s5 + $0x8] sm:$0xff]   ;;  %v767_v12 = vld [vmem:[%s943_s5 + $0x40] sm:$0xff]   ;;  %vm598_vm1 = vcmp.ge.s32.totalorder %v597_v37, 8 }
  0x20   :  { %677 = vmatpush3.bf16.msra.mxu0 %v756_v39  ;;  %p796_p8 = por %p795_p7, %p794_p6 }
  0x21   :  { %345 = vmatpush1.bf16.msra.mxu1 %v719_v13  ;;  %678 = vmatprep.subr.bf16.mxu0 %v757_v40  ;;  %v118_v56 = vrot.slane %v623_v53, %v117_v54  ;;  %v125_v57 = vrot.slane %v111_v55, %v117_v54  ;;  %v768_v13 = vld [vmem:[%s943_s5] sm:$0xff]  }
  0x22   :  { %346 = vmatprep.subr.bf16.mxu1 %v720_v14  ;;  %v656_v14 = vld.sshfl [vmem:[%s942_s4] sm:$0x11 pattern:$0x75316420]  ;;  %p797_p9 = pnand %p796_p8, %p790_p5 }
  0x23   :  { %v127_v58 = vpack.i.b16 %v118_v56, %v118_v56  ;;  %v134_v60 = vpack.i.b16 %v125_v57, %v125_v57 }
  0x24   :  { %679 = vmatpush3.bf16.msra.mxu0 %v758_v41 }
  0x25   :  { %347 = vmatpush1.bf16.msra.mxu1 %v722_v15  ;;  %680 = vmatprep.subr.bf16.mxu0 %v759_v42  ;;  %v132_v62 = vrot.slane %v127_v58, %v131_v59  ;;  %v139_v1 = vrot.slane %v134_v60, %v131_v59  ;;  %v388_v15 = vcombine.high %v656_v14, %v656_v14 }
  0x26   :  { %348 = vmatprep.subr.bf16.mxu1 %v723_v16  ;;  %v395_v16 = vrot.slane %v656_v14, %v117_v54 }
  0x28   :  { %681 = vmatpush3.bf16.msra.mxu0 %v760_v43 }
  0x29   :  { %349 = vmatpush1.bf16.msra.mxu1 %v725_v17  ;;  %682 = vmatprep.subr.bf16.mxu0 %v761_v44  ;;  %v402_v17 = vrot.slane %v388_v15, %v117_v54 }
  0x2a   :  { %350 = vmatprep.subr.bf16.mxu1 %v726_v18  ;;  %v404_v18 = vpack.i.b16 %v395_v16, %v395_v16 }
  0x2c   :  { %683 = vmatpush3.bf16.msra.mxu0 %v762_v45 }
  0x2d   :  { %351 = vmatpush1.bf16.msra.mxu1 %v728_v19  ;;  %684 = vmatprep.subr.bf16.mxu0 %v763_v46  ;;  %v411_v19 = vpack.i.b16 %v402_v17, %v402_v17 }
  0x2e   :  { %352 = vmatprep.subr.bf16.mxu1 %v729_v20 }
  0x30   :  { %685 = vmatpush3.bf16.msra.mxu0 %v764_v47 }
  0x31   :  { %353 = vmatpush2.bf16.msra.mxu1 %v731_v21  ;;  %686 = vmatprep.subr.bf16.mxu0 %v765_v10  ;;  %v409_v21 = vrot.slane %v404_v18, %v131_v59 }
  0x32   :  { %354 = vmatprep.subr.bf16.mxu1 %v732_v22 }
  0x34   :  { %687 = vmatpush3.bf16.msra.mxu0 %v766_v11 }
  0x35   :  { %355 = vmatpush2.bf16.msra.mxu1 %v734_v23  ;;  %688 = vmatprep.subr.bf16.mxu0 %v767_v12  ;;  %v416_v23 = vrot.slane %v411_v19, %v131_v59 }
  0x36   :  { %356 = vmatprep.subr.bf16.mxu1 %v735_v24 }
  0x38   :  { %689 = vmatpush3.bf16.msra.mxu0 %v768_v13 }
  0x39   :  { %357 = vmatpush2.bf16.msra.mxu1 %v737_v25 }
  0x3a   :  { %358 = vmatprep.subr.bf16.mxu1 %v738_v26 }
  0x3d   :  { %359 = vmatpush2.bf16.msra.mxu1 %v740_v27 }
  0x3e   :  { %360 = vmatprep.subr.bf16.mxu1 %v741_v28 }
  0x41   :  { %361 = vmatpush2.bf16.msra.mxu1 %v743_v29 }
  0x42   :  { %362 = vmatprep.subr.bf16.mxu1 %v744_v30 }
  0x45   :  { %363 = vmatpush2.bf16.msra.mxu1 %v746_v31 }
  0x46   :  { %364 = vmatprep.subr.bf16.mxu1 %v747_v32 }
  0x49   :  { %365 = vmatpush2.bf16.msra.mxu1 %v749_v33  ;;  %v657_v33 = vld [vmem:[%s944_s6] ss:$0 sm:$0xff] }
  0x4a   :  { %366 = vmatprep.subr.bf16.mxu1 %v750_v34 }
  0x4d   :  { %367 = vmatpush2.bf16.msra.mxu1 %v752_v35 }
  0xd3   :  { %v93_v61 = vpop.f32.mrf.mxu0 }
  0xd4   :  { %v100_v63 = vpack.c.bf16 %v93_v61, %v93_v61 }
  0xd5   :  { %v95_v2 = vpop.f32.mrf.mxu0 }
  0xd6   :  { %v101_v3 = vpack.c.bf16 %v95_v2, %v95_v2  ;;  %v140_v4 = vadd.bf16 %v132_v62, %v100_v63 }
  0xd7   :  { %v97_v5 = vpop.f32.mrf.mxu0 }
  0xd8   :  { %v141_v6 = vadd.bf16 %v139_v1, %v101_v3  ;;  %v142_v9 = vmax.bf16 %v816_v0, %v140_v4 }
  0xd9   :  { %v98_v7 = vpop.f32.mrf.mxu0 }
  0xda   :  { %v143_v8 = vmax.bf16 %v816_v0, %v141_v6 }
  0xdc   :  { %368 = vmatprep.mubr.bf16.mxu1 %v143_v8 }
  0xdd   :  { %369 = vmatmul.mubr.bf16.vlgmr.msra.gmra.mxu1 %v142_v9 }
 0x19d   :  { %v370_v20 = vpop.f32.mrf.mxu1 }
 0x19e   :  { %v377_v22 = vpack.c.bf16 %v370_v20, %v370_v20 }
 0x19f   :  { %v372_v24 = vpop.f32.mrf.mxu1 }
 0x1a0   :  { %v378_v25 = vpack.c.bf16 %v372_v24, %v372_v24  ;;  %v417_v26 = vadd.bf16 %v409_v21, %v377_v22 }
 0x1a1   :  { %v374_v27 = vpop.f32.mrf.mxu1 }
 0x1a2   :  { %v418_v28 = vadd.bf16 %v416_v23, %v378_v25  ;;  %v419_v31 = vmax.bf16 %v816_v0, %v417_v26 }
 0x1a3   :  { %v375_v29 = vpop.f32.mrf.mxu1 }
 0x1a4   :  { %v420_v30 = vmax.bf16 %v816_v0, %v418_v28 }
 0x1a6   :  { %588 = vmatprep.mubr.bf16.mxu0 %v420_v30 }
 0x1a7   :  { %589 = vmatmul.mubr.bf16.vlgmr.msra.gmra.mxu0 %v419_v31 }
 0x267   :  { %v690_v32 = vpop.f32.mrf.mxu0 }
 0x269   :  { %v691_v34 = vpop.f32.mrf.mxu0 }
 0x26a   :  { %v692_v35 = vadd.f32 %v691_v34, %v690_v32 }
 0x26b   :  { %v693_v36 = vpop.f32.mrf.mxu0 }
 0x26c   :  { %v591_v38 = vadd.f32 %v692_v35, %v657_v33 }
 0x26d   :  { %v694_v39 = vpop.f32.mrf.mxu0 }
 0x26e   :  { %v599_v40 = vmax.f32 %v591_v38, -20.0 }
 0x270   :  { %v600_v41 = vmin.f32 %v599_v40, 2.0 }
 0x272   :  { %v603_v0 = vsel %vm598_vm1, %v600_v41, %v591_v38 }
 0x273   :  { %604 = vst.msk [vmem:[#allocation5] sm:$0xff] %vm55_vm0, %v603_v0 }
 0x274   :  { %800 = shalt.err (!%p797_p9)
}
 0x275   :  { %614 = dma.vmem_to_hbm [thread:$0]  %s612_s21, 128, %s945_s7, [#allocation4]  }
 0x276   :  { %811 = dma.done.wait [#allocation4], 128  }
 0x277   :  { %812 = vsyncadd [#allocation4], 4294967168 }
 0x278   :  { %618 = vsyncpa [#allocation3], 1 }
 0x279   :  { %619 = vsyncpa [#allocation4], 1 }

</bundles_post_ra>
